<compile_context>
chip_gen: v5e
topology: v5e:2x2
jax: 0.10.0
libtpu: 0.0.40
codegen_flags: <defaults>
</compile_context>

<pallas_src>
import jax
import jax.numpy as jnp
from jax.experimental import pallas as pl
from jax.experimental.pallas import tpu as pltpu

LOG_SIG_MAX = 2.0
LOG_SIG_MIN = -20.0


def _policy_fwd_kernel(x_ref,
                       w1_ref, b1_ref,
                       w2_ref, b2_ref,
                       wh_ref, bh_ref,
                       lo_ref, hi_ref,
                       out_ref):
    # Layer 1: single merged matmul (concat already fused into x / W1 layout).
    h = jnp.dot(x_ref[...], w1_ref[...], preferred_element_type=jnp.float32) + b1_ref[...]
    h = jnp.maximum(h, 0.0)

    # Layer 2.
    h = jnp.dot(h, w2_ref[...], preferred_element_type=jnp.float32) + b2_ref[...]
    h = jnp.maximum(h, 0.0)

    # Fused heads: [mean | log_std] in one matmul, then per-column clamp bounds
    # (mean columns have +/-inf bounds -> untouched; log_std columns clamped).
    y = jnp.dot(h, wh_ref[...], preferred_element_type=jnp.float32) + bh_ref[...]
    out_ref[...] = jnp.minimum(jnp.maximum(y, lo_ref[...]), hi_ref[...]).astype(out_ref.dtype)


def _round_up(x, m):
    return (x + m - 1) // m * m


def pack_params(params):
    """One-time repack of PyTorch-layout [out, in] weights into kernel layout.

    In a real training loop this is done once at parameter creation, not per
    forward call.
    """
    out_dim = params["wm"].shape[0]
    lo = jnp.concatenate(
        [jnp.full((1, out_dim), -jnp.inf, jnp.float32),
         jnp.full((1, out_dim), LOG_SIG_MIN, jnp.float32)], axis=1)
    hi = jnp.concatenate(
        [jnp.full((1, out_dim), jnp.inf, jnp.float32),
         jnp.full((1, out_dim), LOG_SIG_MAX, jnp.float32)], axis=1)
    return {
        "w1": params["w1"].T.astype(jnp.float32),                             # [in_dim, h1]
        "b1": params["b1"].astype(jnp.float32),                               # [1, h1]
        "w2": params["w2"].T.astype(jnp.float32),                             # [h1, h2]
        "b2": params["b2"].astype(jnp.float32),                               # [1, h2]
        "wh": jnp.concatenate(
            [params["wm"].T, params["ws"].T], axis=1).astype(jnp.float32),    # [h2, 2*out]
        "bh": jnp.concatenate(
            [params["bm"], params["bs"]], axis=1).astype(jnp.float32),        # [1, 2*out]
        "lo": lo,                                                             # [1, 2*out]
        "hi": hi,                                                             # [1, 2*out]
    }


def policy_forward(obs, w, params, *, block_b=2048):
    """Fused Pallas forward pass. Returns (mean, log_std), both [B, output_dim]."""
    obs = obs.astype(jnp.float32)
    w = w.astype(jnp.float32)
    B = obs.shape[0]
    out_dim = params["wm"].shape[0]

    p = pack_params(params)
    in_dim, h1 = p["w1"].shape
    h2 = p["w2"].shape[1]

    # Host-side concat (reviewer-approved fallback for the merged layer-1 matmul).
    x = jnp.concatenate([obs, w], axis=-1)                      # [B, in_dim]

    # Pad rows only to a sublane multiple (8); last grid block may be ragged.
    b8 = _round_up(B, 8)
    if b8 != B:
        x = jnp.pad(x, ((0, b8 - B), (0, 0)))

    # Batch tile: big enough to amortize per-step overhead, but >= 2 grid steps
    # for non-trivial B so both TensorCores are used on v7x.
    tb = min(block_b, max(8, _round_up(pl.cdiv(b8, 2), 8)))
    grid = pl.cdiv(b8, tb)

    # Raise the scoped-VMEM limit only if the lane-padded, double-buffered
    # activation tiles would exceed the smallest default (v5e: 16 MiB).
    lane_padded = _round_up(in_dim, 128) + _round_up(2 * out_dim, 128)
    buf_bytes = 2 * 4 * tb * lane_padded        # double-buffered in + out tiles
    vmem_limit = None
    if buf_bytes > (12 << 20):
        vmem_limit = min(buf_bytes + (8 << 20), 56 << 20)

    def rows(i):          # batch-tiled activations / output
        return (i, 0)

    def resident(i):      # weights/biases/bounds: same block every step -> stay in VMEM
        return (0, 0)

    out = pl.pallas_call(
        _policy_fwd_kernel,
        out_shape=jax.ShapeDtypeStruct((b8, 2 * out_dim), jnp.float32),
        grid=(grid,),
        in_specs=[
            pl.BlockSpec((tb, in_dim), rows),
            pl.BlockSpec((in_dim, h1), resident),
            pl.BlockSpec((1, h1), resident),
            pl.BlockSpec((h1, h2), resident),
            pl.BlockSpec((1, h2), resident),
            pl.BlockSpec((h2, 2 * out_dim), resident),
            pl.BlockSpec((1, 2 * out_dim), resident),
            pl.BlockSpec((1, 2 * out_dim), resident),
            pl.BlockSpec((1, 2 * out_dim), resident),
        ],
        out_specs=pl.BlockSpec((tb, 2 * out_dim), rows),
        compiler_params=pltpu.CompilerParams(
            dimension_semantics=("parallel",),
            vmem_limit_bytes=vmem_limit),
    )(x, p["w1"], p["b1"], p["w2"], p["b2"], p["wh"], p["bh"], p["lo"], p["hi"])

    mean = out[:B, :out_dim]
    log_std = out[:B, out_dim:]
    return mean, log_std


def init_params(key, obs_dim, rew_dim, output_dim, net_arch=(32, 32)):
    """Deterministic synthetic parameter init (PyTorch Linear layout [out, in])."""
    in_dim = obs_dim + rew_dim
    h1, h2 = net_arch
    ks = jax.random.split(key, 8)
    scale = 0.1
    return {
        "w1": scale * jax.random.normal(ks[0], (h1, in_dim), jnp.float32),
        "b1": scale * jax.random.normal(ks[1], (1, h1), jnp.float32),
        "w2": scale * jax.random.normal(ks[2], (h2, h1), jnp.float32),
        "b2": scale * jax.random.normal(ks[3], (1, h2), jnp.float32),
        "wm": scale * jax.random.normal(ks[4], (output_dim, h2), jnp.float32),
        "bm": scale * jax.random.normal(ks[5], (1, output_dim), jnp.float32),
        "ws": scale * jax.random.normal(ks[6], (output_dim, h2), jnp.float32),
        "bs": scale * jax.random.normal(ks[7], (1, output_dim), jnp.float32),
    }


def _reference_forward(obs, w, params):
    x = jnp.concatenate((obs, w), axis=-1)
    h = jnp.maximum(x @ params["w1"].T + params["b1"], 0.0)
    h = jnp.maximum(h @ params["w2"].T + params["b2"], 0.0)
    mean = h @ params["wm"].T + params["bm"]
    log_std = jnp.clip(h @ params["ws"].T + params["bs"], LOG_SIG_MIN, LOG_SIG_MAX)
    return mean, log_std


if __name__ == "__main__":
    key = jax.random.PRNGKey(0)
    k_obs, k_w, k_params = jax.random.split(key, 3)

    batch = 2
    obs_dim = 16
    rew_dim = 4
    output_dim = 6
    net_arch = (32, 32)

    obs = jax.random.normal(k_obs, (batch, obs_dim), jnp.float32)
    w = jax.random.normal(k_w, (batch, rew_dim), jnp.float32)
    params = init_params(k_params, obs_dim, rew_dim, output_dim, net_arch)

    mean, log_std = policy_forward(obs, w, params)
    jax.block_until_ready((mean, log_std))

    ref_mean, ref_log_std = _reference_forward(obs, w, params)
    # Tolerance accounts for MXU default precision (bf16-pass matmuls) on both
    # the kernel and the XLA reference; exact f32 would require HIGHEST
    # precision (3-6x more MXU passes), which the perf review advises against.
    assert jnp.allclose(mean, ref_mean, atol=1e-2, rtol=1e-2)
    assert jnp.allclose(log_std, ref_log_std, atol=1e-2, rtol=1e-2)

    # TODO(synk): get_action/sample (tanh squash, Normal rsample, log_prob) are left
    # in plain JAX outside this kernel — only Policy.forward is fused here.

    print("KERNEL_OK")
</pallas_src>

<mosaic_0001>
module attributes {stable_mosaic.version = 11 : i64} {
  func.func @_policy_fwd_kernel(%arg0: i32, %arg1: memref<8x20xf32, #tpu.memory_space<vmem>>, %arg2: memref<20x32xf32, #tpu.memory_space<vmem>>, %arg3: memref<1x32xf32, #tpu.memory_space<vmem>>, %arg4: memref<32x32xf32, #tpu.memory_space<vmem>>, %arg5: memref<1x32xf32, #tpu.memory_space<vmem>>, %arg6: memref<32x12xf32, #tpu.memory_space<vmem>>, %arg7: memref<1x12xf32, #tpu.memory_space<vmem>>, %arg8: memref<1x12xf32, #tpu.memory_space<vmem>>, %arg9: memref<1x12xf32, #tpu.memory_space<vmem>>, %arg10: memref<8x12xf32, #tpu.memory_space<vmem>>) attributes {dimension_semantics = [#tpu.dimension_semantics<parallel>], iteration_bounds = array<i64: 1>, scalar_prefetch = 0 : i64, scratch_operands = 0 : i64, tpu.core_type = #tpu.core_type<tc>, window_params = [{transform_indices = @transform_0, window_bounds = array<i64: 8, 20>}, {pipeline_mode = #tpu.pipeline_mode<synchronous>, transform_indices = @transform_1, window_bounds = array<i64: 20, 32>}, {pipeline_mode = #tpu.pipeline_mode<synchronous>, transform_indices = @transform_2, window_bounds = array<i64: 1, 32>}, {pipeline_mode = #tpu.pipeline_mode<synchronous>, transform_indices = @transform_3, window_bounds = array<i64: 32, 32>}, {pipeline_mode = #tpu.pipeline_mode<synchronous>, transform_indices = @transform_4, window_bounds = array<i64: 1, 32>}, {pipeline_mode = #tpu.pipeline_mode<synchronous>, transform_indices = @transform_5, window_bounds = array<i64: 32, 12>}, {pipeline_mode = #tpu.pipeline_mode<synchronous>, transform_indices = @transform_6, window_bounds = array<i64: 1, 12>}, {pipeline_mode = #tpu.pipeline_mode<synchronous>, transform_indices = @transform_7, window_bounds = array<i64: 1, 12>}, {pipeline_mode = #tpu.pipeline_mode<synchronous>, transform_indices = @transform_8, window_bounds = array<i64: 1, 12>}, {transform_indices = @transform_9, window_bounds = array<i64: 8, 12>}]} {
    %c0 = arith.constant 0 : index
    %c0_0 = arith.constant 0 : index
    %0 = vector.load %arg1[%c0, %c0_0] : memref<8x20xf32, #tpu.memory_space<vmem>>, vector<8x20xf32>
    %c0_1 = arith.constant 0 : index
    %c0_2 = arith.constant 0 : index
    %1 = vector.load %arg2[%c0_1, %c0_2] : memref<20x32xf32, #tpu.memory_space<vmem>>, vector<20x32xf32>
    %cst = arith.constant dense<0.000000e+00> : vector<8x32xf32>
    %2 = tpu.matmul %0, %1, %cst {dimension_numbers = #tpu.dot_dimension_numbers<[1], [0], [0], [1], [0, 0, 1, 1], [], []>} : vector<8x20xf32>, vector<20x32xf32>, vector<8x32xf32> -> vector<8x32xf32>
    %c0_3 = arith.constant 0 : index
    %c0_4 = arith.constant 0 : index
    %3 = vector.load %arg3[%c0_3, %c0_4] : memref<1x32xf32, #tpu.memory_space<vmem>>, vector<1x32xf32>
    %4 = vector.broadcast %3 : vector<1x32xf32> to vector<8x32xf32>
    %5 = arith.addf %2, %4 : vector<8x32xf32>
    %cst_5 = arith.constant 0.000000e+00 : f32
    %6 = vector.broadcast %cst_5 : f32 to vector<8x32xf32>
    %7 = arith.maximumf %5, %6 : vector<8x32xf32>
    %c0_6 = arith.constant 0 : index
    %c0_7 = arith.constant 0 : index
    %8 = vector.load %arg4[%c0_6, %c0_7] : memref<32x32xf32, #tpu.memory_space<vmem>>, vector<32x32xf32>
    %cst_8 = arith.constant dense<0.000000e+00> : vector<8x32xf32>
    %9 = tpu.matmul %7, %8, %cst_8 {dimension_numbers = #tpu.dot_dimension_numbers<[1], [0], [0], [1], [0, 0, 1, 1], [], []>} : vector<8x32xf32>, vector<32x32xf32>, vector<8x32xf32> -> vector<8x32xf32>
    %c0_9 = arith.constant 0 : index
    %c0_10 = arith.constant 0 : index
    %10 = vector.load %arg5[%c0_9, %c0_10] : memref<1x32xf32, #tpu.memory_space<vmem>>, vector<1x32xf32>
    %11 = vector.broadcast %10 : vector<1x32xf32> to vector<8x32xf32>
    %12 = arith.addf %9, %11 : vector<8x32xf32>
    %cst_11 = arith.constant 0.000000e+00 : f32
    %13 = vector.broadcast %cst_11 : f32 to vector<8x32xf32>
    %14 = arith.maximumf %12, %13 : vector<8x32xf32>
    %c0_12 = arith.constant 0 : index
    %c0_13 = arith.constant 0 : index
    %15 = vector.load %arg6[%c0_12, %c0_13] : memref<32x12xf32, #tpu.memory_space<vmem>>, vector<32x12xf32>
    %cst_14 = arith.constant dense<0.000000e+00> : vector<8x12xf32>
    %16 = tpu.matmul %14, %15, %cst_14 {dimension_numbers = #tpu.dot_dimension_numbers<[1], [0], [0], [1], [0, 0, 1, 1], [], []>} : vector<8x32xf32>, vector<32x12xf32>, vector<8x12xf32> -> vector<8x12xf32>
    %c0_15 = arith.constant 0 : index
    %c0_16 = arith.constant 0 : index
    %17 = vector.load %arg7[%c0_15, %c0_16] : memref<1x12xf32, #tpu.memory_space<vmem>>, vector<1x12xf32>
    %18 = vector.broadcast %17 : vector<1x12xf32> to vector<8x12xf32>
    %19 = arith.addf %16, %18 : vector<8x12xf32>
    %c0_17 = arith.constant 0 : index
    %c0_18 = arith.constant 0 : index
    %20 = vector.load %arg8[%c0_17, %c0_18] : memref<1x12xf32, #tpu.memory_space<vmem>>, vector<1x12xf32>
    %21 = vector.broadcast %20 : vector<1x12xf32> to vector<8x12xf32>
    %22 = arith.maximumf %19, %21 : vector<8x12xf32>
    %c0_19 = arith.constant 0 : index
    %c0_20 = arith.constant 0 : index
    %23 = vector.load %arg9[%c0_19, %c0_20] : memref<1x12xf32, #tpu.memory_space<vmem>>, vector<1x12xf32>
    %24 = vector.broadcast %23 : vector<1x12xf32> to vector<8x12xf32>
    %25 = arith.minimumf %22, %24 : vector<8x12xf32>
    %c0_21 = arith.constant 0 : index
    %c0_22 = arith.constant 0 : index
    %26 = vector.load %arg10[%c0_21, %c0_22] : memref<8x12xf32, #tpu.memory_space<vmem>>, vector<8x12xf32>
    tpu.vector_store %arg10[%c0_21, %c0_22], %25 {strides = array<i32>} : memref<8x12xf32, #tpu.memory_space<vmem>>, vector<8x12xf32>,
    return
  }
  func.func @transform_0(%arg0: i32) -> (i32, i32) {
    %c0_i32 = arith.constant 0 : i32
    %c0_i32_0 = arith.constant 0 : i32
    return %arg0, %c0_i32 : i32, i32
  }
  func.func @transform_1(%arg0: i32) -> (i32, i32) {
    %c0_i32 = arith.constant 0 : i32
    %c0_i32_0 = arith.constant 0 : i32
    %c0_i32_1 = arith.constant 0 : i32
    return %c0_i32, %c0_i32_0 : i32, i32
  }
  func.func @transform_2(%arg0: i32) -> (i32, i32) {
    %c0_i32 = arith.constant 0 : i32
    %c0_i32_0 = arith.constant 0 : i32
    %c0_i32_1 = arith.constant 0 : i32
    return %c0_i32, %c0_i32_0 : i32, i32
  }
  func.func @transform_3(%arg0: i32) -> (i32, i32) {
    %c0_i32 = arith.constant 0 : i32
    %c0_i32_0 = arith.constant 0 : i32
    %c0_i32_1 = arith.constant 0 : i32
    return %c0_i32, %c0_i32_0 : i32, i32
  }
  func.func @transform_4(%arg0: i32) -> (i32, i32) {
    %c0_i32 = arith.constant 0 : i32
    %c0_i32_0 = arith.constant 0 : i32
    %c0_i32_1 = arith.constant 0 : i32
    return %c0_i32, %c0_i32_0 : i32, i32
  }
  func.func @transform_5(%arg0: i32) -> (i32, i32) {
    %c0_i32 = arith.constant 0 : i32
    %c0_i32_0 = arith.constant 0 : i32
    %c0_i32_1 = arith.constant 0 : i32
    return %c0_i32, %c0_i32_0 : i32, i32
  }
  func.func @transform_6(%arg0: i32) -> (i32, i32) {
    %c0_i32 = arith.constant 0 : i32
    %c0_i32_0 = arith.constant 0 : i32
    %c0_i32_1 = arith.constant 0 : i32
    return %c0_i32, %c0_i32_0 : i32, i32
  }
  func.func @transform_7(%arg0: i32) -> (i32, i32) {
    %c0_i32 = arith.constant 0 : i32
    %c0_i32_0 = arith.constant 0 : i32
    %c0_i32_1 = arith.constant 0 : i32
    return %c0_i32, %c0_i32_0 : i32, i32
  }
  func.func @transform_8(%arg0: i32) -> (i32, i32) {
    %c0_i32 = arith.constant 0 : i32
    %c0_i32_0 = arith.constant 0 : i32
    %c0_i32_1 = arith.constant 0 : i32
    return %c0_i32, %c0_i32_0 : i32, i32
  }
  func.func @transform_9(%arg0: i32) -> (i32, i32) {
    %c0_i32 = arith.constant 0 : i32
    %c0_i32_0 = arith.constant 0 : i32
    return %arg0, %c0_i32 : i32, i32
  }
}

</mosaic_0001>

<bundles_post_ra>
// kernel: tpu_custom_call.1
= control target key start
LH: loop header
LB: loop body
LE: loop exit
PB: predicated region body
PF: predicated region fallthrough
CT: control target
= control target key end

     0   :  { %14 = vsyncpa [#allocation3], 0  ;;  %s346_s0 = inlined_call_operand.vmem [shape: f32[8,20], index: 0, kind: input, shape index: {}]   ;;  %s347_s1 = inlined_call_operand.hbm [shape: f32[20,32], index: 1, kind: input, shape index: {}]   ;;  %s348_s2 = inlined_call_operand.vmem [shape: f32[1,32], index: 2, kind: input, shape index: {}]   ;;  %s349_s3 = inlined_call_operand.vmem [shape: f32[32,32], index: 3, kind: input, shape index: {}]   ;;  %s350_s4 = inlined_call_operand.vmem [shape: f32[1,32], index: 4, kind: input, shape index: {}]   ;;  %s351_s5 = inlined_call_operand.vmem [shape: f32[32,12], index: 5, kind: input, shape index: {}]   ;;  %s352_s6 = inlined_call_operand.vmem [shape: f32[1,12], index: 6, kind: input, shape index: {}]   ;;  %s353_s7 = inlined_call_operand.vmem [shape: f32[1,12], index: 7, kind: input, shape index: {}]   ;;  %s354_s8 = inlined_call_operand.vmem [shape: f32[1,12], index: 8, kind: input, shape index: {}]   ;;  %s355_s9 = inlined_call_operand.hbm [shape: f32[8,12], index: 9, kind: output, shape index: {}]  }
   0x1   :  { %15 = vsyncpa [#allocation4], 0  ;;  %s22_s11 = sshll.u32 %s347_s1, 4  ;;  %s244_s12 = smov [#allocation2]   ;;  %s23_s11 = int_to_ptr.hbm [resolvable:$true] %s22_s11 }
   0x2   :  { %s24_s13 = sshll.u32 %s244_s12, 4  ;;  %s245_s14 = smov 128   ;;  %s25_s13 = int_to_ptr.vmem [resolvable:$true] %s24_s13 }
   0x3   :  { %s246_s15 = smov 8  }
   0x4   :  { %30 = dma.hbm_to_vmem [thread:$0]  %s23_s11, 384, %s25_s13, [#allocation3], %s245_s14, %s245_s14, %s246_s15  }
   0x5   :  { %240 = dma.done.wait [#allocation3], 384  }
   0x6   :  { %241 = vsyncadd [#allocation3], 4294966912  ;;  %vm61_vm0 = vcmask 1043456   ;;  %v52_v0 = vld [vmem:[#allocation2 + $0x10] sm:$0xf]  ;;  %v51_v1 = vld [vmem:[#allocation2 + $0x8] sm:$0xff] }
   0x7   :  { %179 = vmatpush.msk.msra.mxu0 %vm61_vm0, %v52_v0  ;;  %v89_v2 = vld [vmem:[%s349_s3 + $0x18] sm:$0xff]  ;;  %v50_v3 = vld [vmem:[#allocation2] sm:$0xff]  ;;  %vm57_vm1 = vcmask 162816   ;;  %v88_v5 = vld [vmem:[%s349_s3 + $0x10] sm:$0xff]  ;;  %vm94_vm2 = vcmask 261120   ;;  %s247_s1 = smov [#allocation5]  }
   0x8   :  { %110 = vmatpush.msra.mxu1 %v89_v2  ;;  %v49_v4 = vld [vmem:[%s346_s0] sm:$0xff]  ;;  %v87_v6 = vld [vmem:[%s349_s3 + $0x8] sm:$0xff]  ;;  %v122_v8 = vld [vmem:[%s351_s5 + $0x18] sm:$0xff]  ;;  %s169_s20 = sshll.u32 %s355_s9, 4  ;;  %vm160_vm3 = vcmask 97280   ;;  %s170_s20 = int_to_ptr.hbm [resolvable:$true] %s169_s20 }
   0x9   :  { %79 = vmatpush.msra.mxu0 %v51_v1  ;;  %v86_v7 = vld [vmem:[%s349_s3] sm:$0xff]  ;;  %142 = vmatpush.msra.mxu2 %v122_v8  ;;  %v121_v13 = vld [vmem:[%s351_s5 + $0x10] sm:$0xff]  ;;  %v120_v14 = vld [vmem:[%s351_s5 + $0x8] sm:$0xff] }
   0xa   :  { %111 = vmatpush.msra.mxu1 %v88_v5  ;;  %v187_v9 = vld [vmem:[%s348_s2] ss:$0 sm:$0xff] }
   0xb   :  { %80 = vmatpush.msra.mxu0 %v50_v3  ;;  %143 = vmatpush.msra.mxu2 %v121_v13  ;;  %v119_v15 = vld [vmem:[%s351_s5] sm:$0xff] }
   0xc   :  { %180 = vmatmul.msk.f32.vlgmr.msra.gmra.mxu0 %vm57_vm1, %v49_v4  ;;  %112 = vmatpush.msra.mxu1 %v87_v6  ;;  %v188_v16 = vld [vmem:[%s350_s4] ss:$0 sm:$0xff]  ;;  %s167_s4 = sshll.u32 %s247_s1, 4  ;;  %s168_s4 = int_to_ptr.vmem [resolvable:$true] %s167_s4 }
   0xd   :  { %144 = vmatpush.msra.mxu2 %v120_v14  ;;  %v189_v20 = vld [vmem:[%s352_s6] ss:$0 sm:$0xff] }
   0xe   :  { %113 = vmatpush.msra.mxu1 %v86_v7  ;;  %v190_v21 = vld [vmem:[%s353_s7] ss:$0 sm:$0xff] }
   0xf   :  { %145 = vmatpush.msra.mxu2 %v119_v15  ;;  %v191_v24 = vld [vmem:[%s354_s8] ss:$0 sm:$0xff] }
  0x89   :  { %v82_v10 = vpop.f32.mrf.mxu0 }
  0x8a   :  { %v83_v11 = vadd.f32 %v187_v9, %v82_v10 }
  0x8c   :  { %v85_v12 = vmax.f32 %v83_v11, 0.0 }
  0x8e   :  { %181 = vmatmul.msk.f32.vlgmr.msra.gmra.mxu1 %vm94_vm2, %v85_v12 }
 0x10b   :  { %v115_v17 = vpop.f32.mrf.mxu1 }
 0x10c   :  { %v116_v18 = vadd.f32 %v188_v16, %v115_v17 }
 0x10e   :  { %v118_v19 = vmax.f32 %v116_v18, 0.0 }
 0x110   :  { %182 = vmatmul.msk.f32.vlgmr.msra.gmra.mxu2 %vm94_vm2, %v118_v19 }
 0x193   :  { %v147_v22 = vpop.f32.mrf.mxu2 }
 0x194   :  { %v148_v23 = vadd.f32 %v189_v20, %v147_v22 }
 0x196   :  { %v154_v25 = vmax.f32 %v148_v23, %v190_v21 }
 0x198   :  { %v159_v26 = vmin.f32 %v154_v25, %v191_v24 }
 0x19a   :  { %161 = vst.msk [vmem:[#allocation5] sm:$0xff] %vm160_vm3, %v159_v26 }
 0x19b   :  { %172 = dma.vmem_to_hbm [thread:$0]  %s168_s4, 128, %s170_s20, [#allocation4]  }
 0x19c   :  { %242 = dma.done.wait [#allocation4], 128  }
 0x19d   :  { %243 = vsyncadd [#allocation4], 4294967168 }
 0x19e   :  { %177 = vsyncpa [#allocation3], 1 }
 0x19f   :  { %178 = vsyncpa [#allocation4], 1 }

</bundles_post_ra>
